<compile_context>
chip_gen: v5e
topology: v5e:2x2
jax: 0.10.0
libtpu: 0.0.40
codegen_flags: <defaults>
</compile_context>

<pallas_src>
import functools

import jax
import jax.numpy as jnp
from jax import lax
from jax.experimental import pallas as pl
from jax.experimental.pallas import tpu as pltpu


_EPS = 1e-12  # matches F.normalize's clamp_min on the L2 norm


def _kv_memory_kernel(q_ref, k_ref, vT_ref, o_ref, *, topk):
    # q_ref:  [C, T]  channel-first query tile
    # k_ref:  [M, C]  L2-normalized memory keys (bf16 by default), resident across the grid
    # vT_ref: [V, M]  memory values transposed (f32), resident across the grid
    # o_ref:  [V, T]  output tile
    q = q_ref[...].astype(jnp.float32)

    # Per-token L2 normalization:  q * rsqrt(max(sum(q^2), eps^2)) == q / max(||q||, eps).
    # axis=0 is the sublane axis -> cheap VALU folds + small sublane reduce.
    ssq = jnp.sum(q * q, axis=0, keepdims=True)                      # [1, T]
    qn = q * lax.rsqrt(jnp.maximum(ssq, _EPS * _EPS))

    # Cosine similarity on the MXU (keys pre-normalized).  Queries are cast to the key
    # storage dtype (bf16 by default -> MXU-native path), accumulation stays f32.
    k = k_ref[...]
    sim = jnp.dot(k, qn.astype(k.dtype), preferred_element_type=jnp.float32)   # [M, T]

    m_rows = sim.shape[0]
    row = lax.broadcasted_iota(jnp.int32, sim.shape, 0)              # [M, T]
    neg_inf = jnp.float32(-jnp.inf)

    # Unrolled top-k (k static) with first-index tie-break (matches torch.topk / lax.top_k),
    # fused with the sparse weight-matrix build.  Both per-step reductions run along the
    # sublane axis, so the loop is VALU-dominated rather than XLU-bound.
    masked = sim
    wmat = jnp.zeros_like(sim)
    top0 = None
    denom = None
    for t in range(topk):
        m = jnp.max(masked, axis=0, keepdims=True)                               # [1, T]
        hit = masked == m
        first = jnp.min(jnp.where(hit, row, m_rows), axis=0, keepdims=True)      # first argmax
        oh = row == first                                                        # exact one-hot
        if t == 0:
            top0 = m
            e = jnp.ones_like(m)            # exp(m - m) == 1
            denom = e
        else:
            e = jnp.exp(m - top0)
            denom = denom + e
        wmat = jnp.where(oh, e, wmat)       # place unnormalized softmax weight
        if t + 1 < topk:
            masked = jnp.where(oh, neg_inf, masked)

    # output = softmax-weighted sum of selected values == values^T @ wmat (MXU, kept in f32).
    # The softmax normalization is applied to the [V, T] output (V <= M) instead of the
    # [M, T] weight matrix: fewer VALU / store passes.
    out = jnp.dot(vT_ref[...], wmat, preferred_element_type=jnp.float32)         # [V, T]
    inv = pl.reciprocal(denom, approx=True)        # EUP approximate reciprocal ...
    inv = inv * (2.0 - denom * inv)                # ... + one Newton step (~exact)
    o_ref[...] = (out * inv).astype(o_ref.dtype)


def _round_up(x, m):
    return ((x + m - 1) // m) * m


def prepare_kv_memory(keys, values, sim_dtype=jnp.bfloat16):
    """Grid-invariant preprocessing, done ONCE per parameter update (not per forward):
    L2-normalize the keys (stored in `sim_dtype`, bf16 by default) and transpose the values
    to [V, M] so the kernel needs no in-kernel transpose."""
    kf = jnp.asarray(keys, jnp.float32)
    kn = kf * lax.rsqrt(jnp.maximum(jnp.sum(kf * kf, axis=-1, keepdims=True),
                                    _EPS * _EPS))
    k_mem = kn.astype(sim_dtype)                       # [M, C]
    vT = jnp.asarray(values, jnp.float32).T            # [V, M]
    return k_mem, vT


def _kv_memory_read_cf(q_bcs, k_mem, vT, topk, token_tile=512):
    """Core read on channel-first tokens: q_bcs [B, C, S] -> [B, V, S]."""
    B, C, S = q_bcs.shape
    M, Ck = k_mem.shape
    V, Mv = vT.shape
    assert Ck == C, "query channel dim must equal key_dim"
    assert Mv == M
    assert 1 <= topk <= M, "topk must be in [1, mem_size]"

    # Token tiling: a single full-extent tile for small S (no 2-way split: it only pays on a
    # 2-TensorCore v7x and costs an extra grid step elsewhere); lane-dense 512-token tiles
    # for large S, padding S only when actually needed (static Python conditionals).
    if S <= token_tile:
        tile, Sp, qp = S, S, q_bcs
    else:
        tile = _round_up(token_tile, 128)
        Sp = _round_up(S, tile)
        qp = jnp.pad(q_bcs, ((0, 0), (0, 0), (0, Sp - S))) if Sp != S else q_bcs

    # VMEM budget: double-buffered q/out tiles + resident keys/values + [M, T] top-k temps.
    est = (2 * C * tile * 4 + 2 * V * tile * 4
           + 2 * M * C * k_mem.dtype.itemsize + 2 * V * M * 4
           + 8 * M * tile * 4)
    try:
        vmem_cap = pltpu.get_tpu_info().vmem_capacity_bytes
    except Exception:
        vmem_cap = 64 * 1024 * 1024
    # Generation-aware clamp: never request the whole core's VMEM (>= 16 MiB headroom).
    vmem_limit = int(min(max(2 * est, 16 * 1024 * 1024), vmem_cap - 16 * 1024 * 1024))

    out = pl.pallas_call(
        functools.partial(_kv_memory_kernel, topk=topk),
        out_shape=jax.ShapeDtypeStruct((B, V, Sp), q_bcs.dtype),
        grid_spec=pltpu.PrefetchScalarGridSpec(
            num_scalar_prefetch=0,
            grid=(B, Sp // tile),
            in_specs=[
                pl.BlockSpec((None, C, tile), lambda b, s: (b, 0, s)),  # query token tile
                pl.BlockSpec((M, C), lambda b, s: (0, 0)),              # keys (resident)
                pl.BlockSpec((V, M), lambda b, s: (0, 0)),              # values^T (resident)
            ],
            out_specs=pl.BlockSpec((None, V, tile), lambda b, s: (b, 0, s)),
        ),
        compiler_params=pltpu.CompilerParams(
            dimension_semantics=("parallel", "parallel"),
            vmem_limit_bytes=vmem_limit,
        ),
    )(qp, k_mem, vT)
    return out if Sp == S else out[:, :, :S]


def kv_memory_read(query, prepared, topk=3, token_tile=512):
    """Forward pass given a prepared memory (see prepare_kv_memory)."""
    k_mem, vT = prepared
    V = vT.shape[0]
    if query.ndim == 2:
        # _match_vector: [N, key_dim] -> [N, value_dim] (small arrays; the two transposes
        # here are tiny compared with the spatial path they replace).
        N, C = query.shape
        out = _kv_memory_read_cf(query.T.reshape(1, C, N), k_mem, vT, topk, token_tile)
        return out[0].T
    elif query.ndim == 4:
        # _match_spatial: NCHW in, NCHW out.  Channel-first kernel layout -> only free
        # reshapes here (no NCHW<->NHWC transposes, no output slice/copy).
        B, C, H, W = query.shape
        out = _kv_memory_read_cf(query.reshape(B, C, H * W), k_mem, vT, topk, token_tile)
        return out.reshape(B, V, H, W)   # module's .view(B, C, H, W) assumes V == C
    else:
        raise ValueError("Unsupported query shape")


def key_value_memory_forward(query, keys, values, topk=3, sim_dtype=jnp.bfloat16):
    """Equivalent of KeyValueMemory.forward.  For repeated forwards with the same parameters,
    call prepare_kv_memory once and reuse it via kv_memory_read (caches key normalization /
    value transpose across calls)."""
    return kv_memory_read(query, prepare_kv_memory(keys, values, sim_dtype), topk)


# ------------------------- pure-JAX reference (for verification) -------------------------
def _l2_normalize(x, axis):
    # x / max(||x||, eps), written as rsqrt(max(||x||^2, eps^2)) (same math as F.normalize).
    ssq = jnp.sum(jnp.square(x), axis=axis, keepdims=True)
    return x * lax.rsqrt(jnp.maximum(ssq, _EPS * _EPS))


def _ref_forward(query, keys, values, topk=3, sim_dtype=jnp.float32):
    """Faithful port of the torch module.  `sim_dtype` lets the reference apply the same
    input quantization as the kernel's bf16-fed similarity matmul (f32 accumulation)."""
    kn = _l2_normalize(jnp.asarray(keys, jnp.float32), 1).astype(sim_dtype).astype(jnp.float32)
    if query.ndim == 2:
        qn = _l2_normalize(jnp.asarray(query, jnp.float32), 1).astype(sim_dtype).astype(jnp.float32)
        sim = qn @ kn.T
        tv, ti = lax.top_k(sim, topk)
        w = jax.nn.softmax(tv, axis=-1)
        return jnp.sum(w[..., None] * values[ti], axis=1)
    B, C, H, W = query.shape
    q = jnp.transpose(query.reshape(B, C, H * W), (0, 2, 1))
    qn = _l2_normalize(jnp.asarray(q, jnp.float32), -1).astype(sim_dtype).astype(jnp.float32)
    sim = jnp.einsum("bnc,mc->bnm", qn, kn)
    tv, ti = lax.top_k(sim, topk)
    w = jax.nn.softmax(tv, axis=-1)
    out = jnp.sum(values[ti] * w[..., None], axis=2)                 # [B, HW, V]
    V = values.shape[1]
    return jnp.transpose(out, (0, 2, 1)).reshape(B, V, H, W)


if __name__ == "__main__":
    # Deterministic "module parameters" (synthetic, torch.randn-like).  mem_size=100
    # exercises the non-8/128-aligned memory axis; value_dim == key_dim as the module's
    # spatial path implicitly assumes.
    mem_size, key_dim, value_dim, topk = 100, 32, 32, 3
    kp, kv, kq, kq2 = jax.random.split(jax.random.PRNGKey(0), 4)
    keys = jax.random.normal(kp, (mem_size, key_dim), dtype=jnp.float32)
    values = jax.random.normal(kv, (mem_size, value_dim), dtype=jnp.float32)

    B, C, H, W = 2, key_dim, 8, 8
    query_4d = jax.random.normal(kq, (B, C, H, W), dtype=jnp.float32)
    query_2d = jax.random.normal(kq2, (8, key_dim), dtype=jnp.float32)

    # 1) f32-fed similarity path: bit-faithful to the torch forward, tight tolerance.
    prep_f32 = prepare_kv_memory(keys, values, sim_dtype=jnp.float32)
    out_4d = jax.block_until_ready(kv_memory_read(query_4d, prep_f32, topk))
    ref_4d = _ref_forward(query_4d, keys, values, topk)
    assert out_4d.shape == (B, value_dim, H, W)
    assert jnp.allclose(out_4d, ref_4d, atol=1e-4, rtol=1e-4)

    out_2d = jax.block_until_ready(kv_memory_read(query_2d, prep_f32, topk))
    ref_2d = _ref_forward(query_2d, keys, values, topk)
    assert out_2d.shape == (8, value_dim)
    assert jnp.allclose(out_2d, ref_2d, atol=1e-4, rtol=1e-4)

    # 2) Default bf16-fed similarity path (MXU-native), checked against a reference that
    #    applies the same bf16 quantization to the similarity inputs (f32 accumulation).
    prep_bf16 = prepare_kv_memory(keys, values, sim_dtype=jnp.bfloat16)
    out_4d_b = jax.block_until_ready(kv_memory_read(query_4d, prep_bf16, topk))
    ref_4d_b = _ref_forward(query_4d, keys, values, topk, sim_dtype=jnp.bfloat16)
    assert jnp.allclose(out_4d_b, ref_4d_b, atol=5e-4, rtol=5e-4)

    out_2d_b = jax.block_until_ready(kv_memory_read(query_2d, prep_bf16, topk))
    ref_2d_b = _ref_forward(query_2d, keys, values, topk, sim_dtype=jnp.bfloat16)
    assert jnp.allclose(out_2d_b, ref_2d_b, atol=5e-4, rtol=5e-4)

    print("KERNEL_OK")
</pallas_src>

<mosaic_0001>
module attributes {stable_mosaic.version = 11 : i64} {
  func.func @_kv_memory_kernel(%arg0: i32, %arg1: i32, %arg2: memref<1x32x64xf32, #tpu.memory_space<vmem>>, %arg3: memref<100x32xf32, #tpu.memory_space<vmem>>, %arg4: memref<32x100xf32, #tpu.memory_space<vmem>>, %arg5: memref<1x32x64xf32, #tpu.memory_space<vmem>>) attributes {dimension_semantics = [#tpu.dimension_semantics<parallel>, #tpu.dimension_semantics<parallel>], iteration_bounds = array<i64: 2, 1>, scalar_prefetch = 0 : i64, scratch_operands = 0 : i64, tpu.core_type = #tpu.core_type<tc>, window_params = [{transform_indices = @transform_0, window_bounds = array<i64: 1, 32, 64>}, {pipeline_mode = #tpu.pipeline_mode<synchronous>, transform_indices = @transform_1, window_bounds = array<i64: 100, 32>}, {pipeline_mode = #tpu.pipeline_mode<synchronous>, transform_indices = @transform_2, window_bounds = array<i64: 32, 100>}, {transform_indices = @transform_3, window_bounds = array<i64: 1, 32, 64>}]} {
    %c0 = arith.constant 0 : index
    %c0_0 = arith.constant 0 : index
    %c0_1 = arith.constant 0 : index
    %0 = vector.load %arg2[%c0, %c0_0, %c0_1] : memref<1x32x64xf32, #tpu.memory_space<vmem>>, vector<1x32x64xf32>
    %1 = vector.shape_cast %0 : vector<1x32x64xf32> to vector<32x64xf32>
    %2 = arith.mulf %1, %1 : vector<32x64xf32>
    %cst = arith.constant dense<0.000000e+00> : vector<64xf32>
    %3 = vector.multi_reduction <add>, %2, %cst [0] : vector<32x64xf32> to vector<64xf32>
    %4 = vector.shape_cast %3 : vector<64xf32> to vector<1x64xf32>
    %cst_2 = arith.constant 1.000000e-24 : f32
    %5 = vector.broadcast %cst_2 : f32 to vector<1x64xf32>
    %6 = arith.maximumf %4, %5 : vector<1x64xf32>
    %7 = math.rsqrt %6 : vector<1x64xf32>
    %8 = vector.broadcast %7 : vector<1x64xf32> to vector<32x64xf32>
    %9 = arith.mulf %1, %8 : vector<32x64xf32>
    %c0_3 = arith.constant 0 : index
    %c0_4 = arith.constant 0 : index
    %10 = vector.load %arg3[%c0_3, %c0_4] : memref<100x32xf32, #tpu.memory_space<vmem>>, vector<100x32xf32>
    %cst_5 = arith.constant dense<0.000000e+00> : vector<100x64xf32>
    %11 = tpu.matmul %10, %9, %cst_5 {dimension_numbers = #tpu.dot_dimension_numbers<[1], [0], [0], [1], [0, 0, 1, 1], [], []>} : vector<100x32xf32>, vector<32x64xf32>, vector<100x64xf32> -> vector<100x64xf32>
    %12 = tpu.iota {dimensions = array<i32: 0>} : vector<100x64xi32>
    %cst_6 = arith.constant 0.000000e+00 : f32
    %13 = vector.broadcast %cst_6 : f32 to vector<100x64xf32>
    %cst_7 = arith.constant dense<0xFF800000> : vector<64xf32>
    %14 = vector.multi_reduction <maximumf>, %11, %cst_7 [0] : vector<100x64xf32> to vector<64xf32>
    %15 = vector.shape_cast %14 : vector<64xf32> to vector<1x64xf32>
    %16 = vector.broadcast %15 : vector<1x64xf32> to vector<100x64xf32>
    %17 = arith.cmpf oeq, %11, %16 : vector<100x64xf32>
    %c100_i32 = arith.constant 100 : i32
    %18 = vector.broadcast %c100_i32 : i32 to vector<100x64xi32>
    %19 = arith.select %17, %12, %18 : vector<100x64xi1>, vector<100x64xi32>
    %cst_8 = arith.constant dense<2147483647> : vector<64xi32>
    %20 = vector.multi_reduction <minsi>, %19, %cst_8 [0] : vector<100x64xi32> to vector<64xi32>
    %21 = vector.shape_cast %20 : vector<64xi32> to vector<1x64xi32>
    %22 = vector.broadcast %21 : vector<1x64xi32> to vector<100x64xi32>
    %23 = arith.cmpi eq, %12, %22 : vector<100x64xi32>
    %cst_9 = arith.constant 1.000000e+00 : f32
    %24 = vector.broadcast %cst_9 : f32 to vector<1x64xf32>
    %25 = vector.shape_cast %24 : vector<1x64xf32> to vector<1x64xf32>
    %26 = vector.broadcast %25 : vector<1x64xf32> to vector<100x64xf32>
    %27 = arith.select %23, %26, %13 : vector<100x64xi1>, vector<100x64xf32>
    %cst_10 = arith.constant 0xFF800000 : f32
    %28 = vector.broadcast %cst_10 : f32 to vector<100x64xf32>
    %29 = arith.select %23, %28, %11 : vector<100x64xi1>, vector<100x64xf32>
    %cst_11 = arith.constant dense<0xFF800000> : vector<64xf32>
    %30 = vector.multi_reduction <maximumf>, %29, %cst_11 [0] : vector<100x64xf32> to vector<64xf32>
    %31 = vector.shape_cast %30 : vector<64xf32> to vector<1x64xf32>
    %32 = vector.broadcast %31 : vector<1x64xf32> to vector<100x64xf32>
    %33 = arith.cmpf oeq, %29, %32 : vector<100x64xf32>
    %c100_i32_12 = arith.constant 100 : i32
    %34 = vector.broadcast %c100_i32_12 : i32 to vector<100x64xi32>
    %35 = arith.select %33, %12, %34 : vector<100x64xi1>, vector<100x64xi32>
    %cst_13 = arith.constant dense<2147483647> : vector<64xi32>
    %36 = vector.multi_reduction <minsi>, %35, %cst_13 [0] : vector<100x64xi32> to vector<64xi32>
    %37 = vector.shape_cast %36 : vector<64xi32> to vector<1x64xi32>
    %38 = vector.broadcast %37 : vector<1x64xi32> to vector<100x64xi32>
    %39 = arith.cmpi eq, %12, %38 : vector<100x64xi32>
    %40 = arith.subf %31, %15 : vector<1x64xf32>
    %41 = math.exp %40 : vector<1x64xf32>
    %42 = arith.addf %24, %41 : vector<1x64xf32>
    %43 = vector.shape_cast %41 : vector<1x64xf32> to vector<1x64xf32>
    %44 = vector.broadcast %43 : vector<1x64xf32> to vector<100x64xf32>
    %45 = arith.select %39, %44, %27 : vector<100x64xi1>, vector<100x64xf32>
    %cst_14 = arith.constant 0xFF800000 : f32
    %46 = vector.broadcast %cst_14 : f32 to vector<100x64xf32>
    %47 = arith.select %39, %46, %29 : vector<100x64xi1>, vector<100x64xf32>
    %cst_15 = arith.constant dense<0xFF800000> : vector<64xf32>
    %48 = vector.multi_reduction <maximumf>, %47, %cst_15 [0] : vector<100x64xf32> to vector<64xf32>
    %49 = vector.shape_cast %48 : vector<64xf32> to vector<1x64xf32>
    %50 = vector.broadcast %49 : vector<1x64xf32> to vector<100x64xf32>
    %51 = arith.cmpf oeq, %47, %50 : vector<100x64xf32>
    %c100_i32_16 = arith.constant 100 : i32
    %52 = vector.broadcast %c100_i32_16 : i32 to vector<100x64xi32>
    %53 = arith.select %51, %12, %52 : vector<100x64xi1>, vector<100x64xi32>
    %cst_17 = arith.constant dense<2147483647> : vector<64xi32>
    %54 = vector.multi_reduction <minsi>, %53, %cst_17 [0] : vector<100x64xi32> to vector<64xi32>
    %55 = vector.shape_cast %54 : vector<64xi32> to vector<1x64xi32>
    %56 = vector.broadcast %55 : vector<1x64xi32> to vector<100x64xi32>
    %57 = arith.cmpi eq, %12, %56 : vector<100x64xi32>
    %58 = arith.subf %49, %15 : vector<1x64xf32>
    %59 = math.exp %58 : vector<1x64xf32>
    %60 = arith.addf %42, %59 : vector<1x64xf32>
    %61 = vector.shape_cast %59 : vector<1x64xf32> to vector<1x64xf32>
    %62 = vector.broadcast %61 : vector<1x64xf32> to vector<100x64xf32>
    %63 = arith.select %57, %62, %45 : vector<100x64xi1>, vector<100x64xf32>
    %c0_18 = arith.constant 0 : index
    %c0_19 = arith.constant 0 : index
    %64 = vector.load %arg4[%c0_18, %c0_19] : memref<32x100xf32, #tpu.memory_space<vmem>>, vector<32x100xf32>
    %cst_20 = arith.constant dense<0.000000e+00> : vector<32x64xf32>
    %65 = tpu.matmul %64, %63, %cst_20 {dimension_numbers = #tpu.dot_dimension_numbers<[1], [0], [0], [1], [0, 0, 1, 1], [], []>} : vector<32x100xf32>, vector<100x64xf32>, vector<32x64xf32> -> vector<32x64xf32>
    %66 = tpu.reciprocal %60 {approx = true} : vector<1x64xf32> -> vector<1x64xf32>
    %67 = arith.mulf %60, %66 : vector<1x64xf32>
    %cst_21 = arith.constant 2.000000e+00 : f32
    %68 = vector.broadcast %cst_21 : f32 to vector<1x64xf32>
    %69 = arith.subf %68, %67 : vector<1x64xf32>
    %70 = arith.mulf %66, %69 : vector<1x64xf32>
    %71 = vector.broadcast %70 : vector<1x64xf32> to vector<32x64xf32>
    %72 = arith.mulf %65, %71 : vector<32x64xf32>
    %c0_22 = arith.constant 0 : index
    %c0_23 = arith.constant 0 : index
    %c0_24 = arith.constant 0 : index
    %73 = vector.load %arg5[%c0_22, %c0_23, %c0_24] : memref<1x32x64xf32, #tpu.memory_space<vmem>>, vector<1x32x64xf32>
    %74 = vector.shape_cast %73 : vector<1x32x64xf32> to vector<32x64xf32>
    %75 = vector.shape_cast %72 : vector<32x64xf32> to vector<1x32x64xf32>
    tpu.vector_store %arg5[%c0_22, %c0_23, %c0_24], %75 {strides = array<i32>} : memref<1x32x64xf32, #tpu.memory_space<vmem>>, vector<1x32x64xf32>,
    return
  }
  func.func @transform_0(%arg0: i32, %arg1: i32) -> (i32, i32, i32) {
    %c0_i32 = arith.constant 0 : i32
    %c0_i32_0 = arith.constant 0 : i32
    return %arg0, %c0_i32, %arg1 : i32, i32, i32
  }
  func.func @transform_1(%arg0: i32, %arg1: i32) -> (i32, i32) {
    %c0_i32 = arith.constant 0 : i32
    %c0_i32_0 = arith.constant 0 : i32
    %c0_i32_1 = arith.constant 0 : i32
    return %c0_i32, %c0_i32_0 : i32, i32
  }
  func.func @transform_2(%arg0: i32, %arg1: i32) -> (i32, i32) {
    %c0_i32 = arith.constant 0 : i32
    %c0_i32_0 = arith.constant 0 : i32
    %c0_i32_1 = arith.constant 0 : i32
    return %c0_i32, %c0_i32_0 : i32, i32
  }
  func.func @transform_3(%arg0: i32, %arg1: i32) -> (i32, i32, i32) {
    %c0_i32 = arith.constant 0 : i32
    %c0_i32_0 = arith.constant 0 : i32
    return %arg0, %c0_i32, %arg1 : i32, i32, i32
  }
}

</mosaic_0001>

<bundles_post_ra>
// kernel: tpu_custom_call.1
= control target key start
LH: loop header
LB: loop body
LE: loop exit
PB: predicated region body
PF: predicated region fallthrough
CT: control target
= control target key end

     0   :  { %8 = vsyncpa [#allocation3], 0  ;;  %s2018_s0 = inlined_call_operand.vmem [shape: f32[2,32,64], index: 0, kind: input, shape index: {}]   ;;  %s2019_s1 = inlined_call_operand.vmem [shape: f32[100,32], index: 1, kind: input, shape index: {}]   ;;  %s2020_s2 = inlined_call_operand.vmem [shape: f32[32,100], index: 2, kind: input, shape index: {}]   ;;  %s2021_s3 = inlined_call_operand.hbm [shape: f32[2,32,64], index: 3, kind: output, shape index: {}]  }
   0x1   :  { %10 = vsyncpa [#allocation3 + $0x1], 0  ;;  %s1156_s12 = smov 0   ;;  %s1158_s13 = smov 0  }
   0x2   :  { %s1160_s14 = smov 0   ;;  %s1162_s15 = smov 0  }
   0x3   :  { %s1164_s16 = smov 0   ;;  %s1166_s17 = smov 0  }
   0x4 LB: > { %s933_s18 = sadd.s32 4294967295, %s1131_s17   ;;  %s934_s19 = sadd.s32 4294967294, %s1131_s17   ;;  %s1131_s17 = sphi %s1166_s17, %s16_s17   ;;  %s1127_s16 = sphi %s1164_s16, %s2052_s16   ;;  %s1123_s15 = sphi %s1162_s15, %s2051_s15   ;;  %s1119_s14 = sphi %s1160_s14, %s2050_s14   ;;  %s1115_s13 = sphi %s1158_s13, %s2049_s13   ;;  %s1111_s12 = sphi %s1156_s12, %s2048_s12  }
   0x5   : > { %s28_s20 = sadd.s32 1, %s1127_s16  ;;  %s107_s21 = sadd.s32 1, %s1119_s14 }
   0x6   : > { %p30_p0 = scmp.ge.s32.totalorder %s28_s20, 2  ;;  %p117_p1 = scmp.ne.s32.totalorder %s1119_s14, %s1115_s13 }
   0x7   : > { %p118_p2 = scmp.eq.s32.totalorder %s933_s18, 1  ;;  %p123_p3 = scmp.ne.s32.totalorder %s1115_s13, %s1111_s12 }
   0x8   : > { %s2054_s20 = smov (%p30_p0, %s28_s20), 0  ;;  %p124_p5 = scmp.eq.s32.totalorder %s934_s19, 1 }
   0x9   : > { %p1196_p4 = por %p118_p2, %p117_p1  ;;  %s102_s23 = ssub.s32 %s1127_s16, %s2054_s20 }
   0xa   : > { %p937_p6 = scmp.ge.s32.totalorder %s1131_s17, 1  ;;  %p105_p7 = scmp.eq.s32.totalorder %s102_s23, 0 }
   0xb   : > { %p1203_p8 = por %p124_p5, %p123_p3  ;;  %p159_p9 = scmp.lt.s32.totalorder %s1131_s17, 3 }
   0xc   : > { %s1209_s25 = scalar_select %p105_p7, %s1119_s14, %s107_s21  }
   0xd   : > { %p160_p10 = pnand %p937_p6, %p159_p9 }
   0xe   : > { %p186_p11 = scmp.lt.s32.totalorder (!%p160_p10), %s1123_s15, 1  ;;  %s183_s4 = sand.u32 (!%p160_p10), 1, %s1115_s13  }
   0xf   : > { %163 = sbr.rel (%p160_p10) target bundleno = 589 (0x24d), region = 32  ;;  %s938_s5 = sshll.u32 (!%p160_p10), %s183_s4, 5 }
  0x10   : > { %s185_s6 = scalar_lea.vmem (!%p160_p10), [#allocation2], %s938_s5  ;;  %s965_s7 = sshll.u32 (!%p160_p10), %s1123_s15, 5 }
  0x11   : > { %s851_s10 = scalar_lea.hbm (!%p160_p10), %s2021_s3, %s965_s7  ;;  %s852_s11 = sshll.u32 (!%p160_p10), %s185_s6, 4  ;;  %s853_s11 = int_to_ptr.vmem [resolvable:$true] %s852_s11 }
  0x12   : > { %s854_s18 = sshll.u32 (!%p160_p10), %s851_s10, 4  ;;  %s839_s19 = scalar_lea.sflag (!%p160_p10), [#allocation3], %s183_s4  ;;  %s855_s18 = int_to_ptr.hbm [resolvable:$true] %s854_s18 }
  0x14   : > { %s187_s26 = scalar_select %p186_p11, %s1123_s15, 1  ;;  %vm202_vm0 = vcmask 523264   ;;  %v231_v33 = vld [vmem:[%s2019_s1] sm:$0xff]  ;;  %vm244_vm4 = vcmask 261120   ;;  %v236_v34 = vld [vmem:[%s2019_s1 + $0x28] sm:$0xff]  ;;  %v241_v35 = vld [vmem:[%s2019_s1 + $0x50] sm:$0xff] }
  0x15   : > { %v232_v36 = vld [vmem:[%s2019_s1 + $0x8] sm:$0xff]  ;;  %v237_v37 = vld [vmem:[%s2019_s1 + $0x30] sm:$0xff]  ;;  %v242_v38 = vld [vmem:[%s2019_s1 + $0x58] sm:$0xff]  ;;  %vm374_vm5 = vcmask 519168   ;;  %s1067_s15 = sshra.s32 %s855_s18, 4  ;;  %s1068_s15 = int_to_ptr.hbm [resolvable:$true] %s1067_s15 }
  0x16   : > { %s964_s27 = sshll.u32 %s187_s26, 5  ;;  %v233_v39 = vld [vmem:[%s2019_s1 + $0x10] sm:$0xff]  ;;  %v238_v40 = vld [vmem:[%s2019_s1 + $0x38] sm:$0xff]  ;;  %v243_v41 = vld [vmem:[%s2019_s1 + $0x60] sm:$0xf]  ;;  %s1069_s21 = scalar_lea.hbm %s1068_s15, 32 }
  0x17   : > { %s193_s30 = scalar_lea.vmem %s2018_s0, %s964_s27  ;;  %v234_v42 = vld [vmem:[%s2019_s1 + $0x18] sm:$0xff]  ;;  %v239_v43 = vld [vmem:[%s2019_s1 + $0x40] sm:$0xff]  ;;  %v240_v45 = vld [vmem:[%s2019_s1 + $0x48] sm:$0xff]  ;;  %p1070_p12 = scmp.ne.s32.totalorder %s1068_s15, %s1069_s21 }
  0x18   : > { %v194_v0 = vld [vmem:[%s193_s30] sm:$0xff]  ;;  %v195_v1 = vld [vmem:[%s193_s30 + $0x8] sm:$0xff]  ;;  %v196_v2 = vld [vmem:[%s193_s30 + $0x10] sm:$0xff]  ;;  %s1073_s27 = scalar_lea.hbm %s2021_s3, 64  ;;  %p1074_p1 = scmp.lt.s32.totalorder %s1068_s15, %s2021_s3 }
  0x19   : > { %v197_v3 = vld [vmem:[%s193_s30 + $0x18] sm:$0xff]  ;;  %v198_v4 = vmul.f32 %v194_v0, %v194_v0  ;;  %v199_v5 = vmul.f32 %v195_v1, %v195_v1  ;;  %v200_v6 = vmul.f32 %v196_v2, %v196_v2  ;;  %v235_v44 = vld [vmem:[%s2019_s1 + $0x20] sm:$0xff]  ;;  %p1071_p13 = pnand %p1070_p12, %p1196_p4  ;;  %p1075_p2 = scmp.lt.s32.totalorder %s1073_s27, %s1069_s21 }
  0x1a   : > { %v201_v7 = vmul.f32 %v197_v3, %v197_v3 }
  0x1b   : > { %v203_v8 = vsel %vm202_vm0, %v198_v4, 0.0  ;;  %v204_v9 = vsel %vm202_vm0, %v199_v5, 0.0  ;;  %v206_v10 = vsel %vm202_vm0, %v200_v6, 0.0  ;;  %p1072_p0 = pneg %p1071_p13  ;;  %p1076_p3 = por %p1075_p2, %p1074_p1 }
  0x1c   : > { %v205_v11 = vadd.f32 %v204_v9, %v203_v8  ;;  %v208_v12 = vsel %vm202_vm0, %v201_v7, 0.0 }
  0x1d   : > { %p1077_p5 = pnand %p1076_p3, %p1072_p0 }
  0x1e   : > { %v207_v13 = vadd.f32 %v206_v10, %v205_v11 }
  0x20   : > { %v209_v14 = vadd.f32 %v208_v12, %v207_v13 }
  0x22   : > { %v210_v15 = vrot.slane %v209_v14, 4 }
  0x24   : > { %v211_v16 = vadd.f32 %v210_v15, %v209_v14 }
  0x26   : > { %v212_v17 = vrot.slane %v211_v16, 2 }
  0x28   : > { %v213_v18 = vadd.f32 %v212_v17, %v211_v16 }
  0x2a   : > { %v214_v19 = vrot.slane %v213_v18, 1 }
  0x2c   : > { %v215_v20 = vadd.f32 %v214_v19, %v213_v18 }
  0x2e   : > { %v216_v21 = vmax.f32 %v215_v20, 1e-24  ;;  %v340_v20 = vlaneseq }
  0x30   : > { %1045 = vrsqrt.f32 %v216_v21  ;;  %vm223_vm1 = vweird.f32 %v216_v21 }
  0x36   : > { %v1046_v22 = vpop.eup %1045 }
  0x37   : > { %v218_v23 = vmul.f32 %v1046_v22, %v216_v21  ;;  %vm224_vm2 = vweird.f32 %v1046_v22 }
  0x38   : > { %vm225_vm3 = vmor %vm223_vm1, %vm224_vm2 }
  0x39   : > { %v219_v24 = vmul.f32 %v1046_v22, %v218_v23  ;;  %v1324_v23 = vshrl.u32 %v340_v20, 7 }
  0x3b   : > { %v220_v25 = vmul.f32 0.5, %v219_v24 }
  0x3d   : > { %v221_v26 = vsub.f32 1.5, %v220_v25 }
  0x3f   : > { %v222_v27 = vmul.f32 %v1046_v22, %v221_v26  ;;  %v1327_v26 = vadd.s32 8, %v1324_v23 }
  0x41   : > { %v226_v28 = vsel %vm225_vm3, %v1046_v22, %v222_v27 }
  0x42   : > { %v230_v29 = vmul.f32 %v226_v28, %v197_v3  ;;  %v229_v30 = vmul.f32 %v226_v28, %v196_v2  ;;  %v228_v31 = vmul.f32 %v226_v28, %v195_v1  ;;  %v227_v32 = vmul.f32 %v226_v28, %v194_v0 }
  0x43   : > { %v1330_v28 = vadd.s32 16, %v1324_v23 }
  0x44   : > { %296 = vmatpush.msra.mxu0 %v230_v29  ;;  %966 = vmatpush.msra.mxu2 %v230_v29 }
  0x45   : > { %967 = vmatpush.msra.mxu3 %v230_v29  ;;  %v1333_v29 = vadd.s32 24, %v1324_v23 }
  0x46   : > { %297 = vmatpush.msra.mxu0 %v229_v30  ;;  %968 = vmatpush.msra.mxu2 %v229_v30 }
  0x47   : > { %969 = vmatpush.msra.mxu3 %v229_v30  ;;  %v1336_v30 = vadd.s32 32, %v1324_v23 }
  0x48   : > { %298 = vmatpush.msra.mxu0 %v228_v31  ;;  %970 = vmatpush.msra.mxu2 %v228_v31 }
  0x49   : > { %971 = vmatpush.msra.mxu3 %v228_v31  ;;  %v1339_v31 = vadd.s32 40, %v1324_v23 }
  0x4a   : > { %299 = vmatpush.msra.mxu0 %v227_v32  ;;  %972 = vmatpush.msra.mxu2 %v227_v32 }
  0x4b   : > { %941 = vmatmul.msk.f32.vlgmr.msra.gmra.mxu0 %vm244_vm4, %v231_v33  ;;  %946 = vmatmul.msk.f32.vlgmr.msra.gmra.mxu2 %vm244_vm4, %v236_v34  ;;  %v1345_v33 = vadd.s32 56, %v1324_v23  ;;  %v1348_v34 = vadd.s32 64, %v1324_v23 }
  0x4c   : > { %973 = vmatpush.msra.mxu3 %v227_v32  ;;  %v1342_v32 = vadd.s32 48, %v1324_v23 }
  0x4d   : > { %951 = vmatmul.msk.f32.vlgmr.msra.gmra.mxu3 %vm244_vm4, %v241_v35 }
  0x53   : > { %942 = vmatmul.msk.f32.gmra.mxu0 %vm244_vm4, %v232_v36  ;;  %947 = vmatmul.msk.f32.gmra.mxu2 %vm244_vm4, %v237_v37  ;;  %v1353_v36 = vadd.s32 72, %v1324_v23  ;;  %v1356_v37 = vadd.s32 80, %v1324_v23 }
  0x55   : > { %952 = vmatmul.msk.f32.gmra.mxu3 %vm244_vm4, %v242_v38  ;;  %v1359_v38 = vadd.s32 88, %v1324_v23 }
  0x5b   : > { %943 = vmatmul.msk.f32.gmra.mxu0 %vm244_vm4, %v233_v39  ;;  %948 = vmatmul.msk.f32.gmra.mxu2 %vm244_vm4, %v238_v40  ;;  %v1362_v39 = vadd.s32 96, %v1324_v23 }
  0x5d   : > { %953 = vmatmul.msk.f32.gmra.mxu3 %vm244_vm4, %v243_v41 }
  0x63   : > { %944 = vmatmul.msk.f32.gmra.mxu0 %vm244_vm4, %v234_v42  ;;  %949 = vmatmul.msk.f32.gmra.mxu2 %vm244_vm4, %v239_v43 }
  0x6b   : > { %945 = vmatmul.msk.f32.gmra.mxu0 %vm244_vm4, %v235_v44  ;;  %950 = vmatmul.msk.f32.gmra.mxu2 %vm244_vm4, %v240_v45 }
  0xc8   : > { %v1272_v46 = vpop.f32.mrf.mxu0 }
  0xc9   : > { %v354_v58 = vsel %vm202_vm0, %v1272_v46, -inf }
  0xce   : > { %v1274_v47 = vpop.f32.mrf.mxu2 }
  0xcf   : > { %v360_v7 = vsel %vm202_vm0, %v1274_v47, -inf }
  0xd0   : > { %v1276_v48 = vpop.f32.mrf.mxu0  ;;  %v1282_v51 = vpop.f32.mrf.mxu3 }
  0xd1   : > { %v355_v1 = vsel %vm202_vm0, %v1276_v48, -inf  ;;  %v370_v8 = vsel %vm202_vm0, %v1282_v51, -inf }
  0xd2   : > { %v361_v10 = vmax.f32 %v355_v1, %v360_v7 }
  0xd6   : > { %v1278_v49 = vpop.f32.mrf.mxu2 }
  0xd7   : > { %v362_v2 = vsel %vm202_vm0, %v1278_v49, -inf }
  0xd8   : > { %v1280_v50 = vpop.f32.mrf.mxu0  ;;  %v1288_v54 = vpop.f32.mrf.mxu3 }
  0xd9   : > { %v356_v59 = vsel %vm202_vm0, %v1280_v50, -inf  ;;  %v372_v3 = vsel %vm202_vm0, %v1288_v54, -inf }
  0xda   : > { %v363_v5 = vmax.f32 %v356_v59, %v362_v2 }
  0xdc   : > { %v371_v14 = vmax.f32 %v363_v5, %v370_v8 }
  0xde   : > { %v1284_v52 = vpop.f32.mrf.mxu2 }
  0xdf   : > { %v364_v60 = vsel %vm202_vm0, %v1284_v52, -inf }
  0xe0   : > { %v1286_v53 = vpop.f32.mrf.mxu0  ;;  %v1304_v0 = vpop.f32.mrf.mxu3 }
  0xe1   : > { %v357_v56 = vsel %vm202_vm0, %v1286_v53, -inf  ;;  %v375_v9 = vsel %vm374_vm5, %v1304_v0, -inf }
  0xe2   : > { %v365_v62 = vmax.f32 %v357_v56, %v364_v60 }
  0xe4   : > { %v373_v11 = vmax.f32 %v365_v62, %v372_v3 }
  0xe6   : > { %v1290_v55 = vpop.f32.mrf.mxu2  ;;  %v378_v17 = vmax.f32 %v371_v14, %v373_v11 }
  0xe7   : > { %v366_v4 = vsel %vm202_vm0, %v1290_v55, -inf }
  0xe8   : > { %v1294_v57 = vpop.f32.mrf.mxu0 }
  0xe9   : > { %v358_v61 = vsel %vm202_vm0, %v1294_v57, -inf }
  0xea   : > { %v359_v63 = vmax.f32 %v354_v58, %v358_v61 }
  0xec   : > { %v367_v6 = vmax.f32 %v359_v63, %v366_v4 }
  0xee   : > { %v1320_v12 = vpop.f32.mrf.mxu2  ;;  %v376_v15 = vmax.f32 %v367_v6, %v375_v9 }
  0xef   : > { %v368_v13 = vsel %vm202_vm0, %v1320_v12, -inf }
  0xf0   : > { %v369_v16 = vmax.f32 %v361_v10, %v368_v13 }
  0xf2   : > { %v377_v18 = vmax.f32 %v376_v15, %v369_v16 }
  0xf4   : > { %v379_v19 = vmax.f32 %v377_v18, %v378_v17 }
  0xf6   : > { %v380_v21 = vrot.slane %v379_v19, 4 }
  0xf8   : > { %v381_v22 = vmax.f32 %v379_v19, %v380_v21 }
  0xfa   : > { %v382_v24 = vrot.slane %v381_v22, 2 }
  0xfc   : > { %v383_v25 = vmax.f32 %v381_v22, %v382_v24 }
  0xfe   : > { %v384_v27 = vrot.slane %v383_v25, 1 }
 0x100   : > { %v1350_v35 = vmax.f32 %v383_v25, %v384_v27 }
 0x102   : > { %vm386_vm6 = vcmp.eq.f32.partialorder %v1272_v46, %v1350_v35  ;;  %vm387_vm7 = vcmp.eq.f32.partialorder %v1276_v48, %v1350_v35  ;;  %vm388_vm8 = vcmp.eq.f32.partialorder %v1280_v50, %v1350_v35  ;;  %vm389_vm9 = vcmp.eq.f32.partialorder %v1286_v53, %v1350_v35 }
 0x103   : > { %vm390_vm10 = vcmp.eq.f32.partialorder %v1294_v57, %v1350_v35  ;;  %vm391_vm11 = vcmp.eq.f32.partialorder %v1274_v47, %v1350_v35  ;;  %vm392_vm12 = vcmp.eq.f32.partialorder %v1278_v49, %v1350_v35  ;;  %vm393_vm13 = vcmp.eq.f32.partialorder %v1284_v52, %v1350_v35 }
 0x104   : > { %vm394_vm14 = vcmp.eq.f32.partialorder %v1290_v55, %v1350_v35  ;;  %vm395_vm15 = vcmp.eq.f32.partialorder %v1320_v12, %v1350_v35  ;;  %vm396_vm1 = vcmp.eq.f32.partialorder %v1282_v51, %v1350_v35  ;;  %vm397_vm2 = vcmp.eq.f32.partialorder %v1288_v54, %v1350_v35 }
 0x105   : > { %vm398_vm3 = vcmp.eq.f32.partialorder %v1304_v0, %v1350_v35  ;;  %v399_v40 = vsel %vm386_vm6, %v1324_v23, 100  ;;  %v400_v41 = vsel %vm387_vm7, %v1327_v26, 100  ;;  %v401_v42 = vsel %vm388_vm8, %v1330_v28, 100 }
 0x106   : > { %v402_v43 = vsel %vm389_vm9, %v1333_v29, 100  ;;  %v403_v44 = vsel %vm390_vm10, %v1336_v30, 100  ;;  %v404_v45 = vsel %vm391_vm11, %v1339_v31, 100  ;;  %v405_v56 = vsel %vm392_vm12, %v1342_v32, 100 }
 0x107   : > { %v406_v58 = vsel %vm393_vm13, %v1345_v33, 100  ;;  %v407_v59 = vsel %vm394_vm14, %v1348_v34, 100  ;;  %v408_v60 = vsel %vm395_vm15, %v1353_v36, 100  ;;  %v409_v61 = vsel %vm396_vm1, %v1356_v37, 100 }
 0x108   : > { %v410_v62 = vsel %vm397_vm2, %v1359_v38, 100  ;;  %v411_v63 = vsel %vm398_vm3, %v1362_v39, 100  ;;  %v412_v1 = vsel %vm202_vm0, %v399_v40, 2147483647  ;;  %v413_v2 = vsel %vm202_vm0, %v400_v41, 2147483647 }
 0x109   : > { %v414_v3 = vsel %vm202_vm0, %v401_v42, 2147483647  ;;  %v415_v4 = vsel %vm202_vm0, %v402_v43, 2147483647  ;;  %v416_v5 = vsel %vm202_vm0, %v403_v44, 2147483647 }
 0x10a   : > { %vm417_vm4 = vcmp.lt.s32.totalorder %v412_v1, %v416_v5  ;;  %v419_v6 = vsel %vm202_vm0, %v404_v45, 2147483647  ;;  %v422_v7 = vsel %vm202_vm0, %v405_v56, 2147483647  ;;  %v425_v8 = vsel %vm202_vm0, %v406_v58, 2147483647 }
 0x10b   : > { %v418_v9 = vsel %vm417_vm4, %v412_v1, %v416_v5  ;;  %vm420_vm6 = vcmp.lt.s32.totalorder %v413_v2, %v419_v6  ;;  %vm423_vm7 = vcmp.lt.s32.totalorder %v414_v3, %v422_v7  ;;  %vm426_vm8 = vcmp.lt.s32.totalorder %v415_v4, %v425_v8 }
 0x10c   : > { %v421_v10 = vsel %vm420_vm6, %v413_v2, %v419_v6  ;;  %v424_v11 = vsel %vm423_vm7, %v414_v3, %v422_v7  ;;  %v427_v13 = vsel %vm426_vm8, %v415_v4, %v425_v8  ;;  %v428_v14 = vsel %vm202_vm0, %v407_v59, 2147483647 }
 0x10d   : > { %vm429_vm9 = vcmp.lt.s32.totalorder %v418_v9, %v428_v14  ;;  %v431_v15 = vsel %vm202_vm0, %v408_v60, 2147483647  ;;  %v434_v16 = vsel %vm202_vm0, %v409_v61, 2147483647  ;;  %v437_v17 = vsel %vm202_vm0, %v410_v62, 2147483647 }
 0x10e   : > { %v430_v18 = vsel %vm429_vm9, %v418_v9, %v428_v14  ;;  %vm432_vm10 = vcmp.lt.s32.totalorder %v421_v10, %v431_v15  ;;  %vm435_vm11 = vcmp.lt.s32.totalorder %v424_v11, %v434_v16  ;;  %vm438_vm12 = vcmp.lt.s32.totalorder %v427_v13, %v437_v17 }
 0x10f   : > { %v436_v19 = vsel %vm435_vm11, %v424_v11, %v434_v16  ;;  %v439_v20 = vsel %vm438_vm12, %v427_v13, %v437_v17  ;;  %v440_v21 = vsel %vm374_vm5, %v411_v63, 2147483647  ;;  %v433_v22 = vsel %vm432_vm10, %v421_v10, %v431_v15 }
 0x110   : > { %vm441_vm13 = vcmp.lt.s32.totalorder %v430_v18, %v440_v21  ;;  %vm445_vm14 = vcmp.lt.s32.totalorder %v436_v19, %v439_v20 }
 0x111   : > { %v442_v24 = vsel %vm441_vm13, %v430_v18, %v440_v21  ;;  %v446_v27 = vsel %vm445_vm14, %v436_v19, %v439_v20 }
 0x112   : > { %vm443_vm15 = vcmp.lt.s32.totalorder %v442_v24, %v433_v22 }
 0x113   : > { %v444_v25 = vsel %vm443_vm15, %v442_v24, %v433_v22 }
 0x114   : > { %vm447_vm1 = vcmp.lt.s32.totalorder %v444_v25, %v446_v27 }
 0x115   : > { %v448_v40 = vsel %vm447_vm1, %v444_v25, %v446_v27 }
 0x116   : > { %v449_v41 = vrot.slane %v448_v40, 4 }
 0x118   : > { %vm450_vm2 = vcmp.lt.s32.totalorder %v448_v40, %v449_v41 }
 0x119   : > { %v451_v42 = vsel %vm450_vm2, %v448_v40, %v449_v41 }
 0x11a   : > { %v452_v43 = vrot.slane %v451_v42, 2 }
 0x11c   : > { %vm453_vm3 = vcmp.lt.s32.totalorder %v451_v42, %v452_v43 }
 0x11d   : > { %v454_v44 = vsel %vm453_vm3, %v451_v42, %v452_v43 }
 0x11e   : > { %v455_v45 = vrot.slane %v454_v44, 1 }
 0x120   : > { %vm456_vm4 = vcmp.lt.s32.totalorder %v454_v44, %v455_v45 }
 0x121   : > { %v1416_v56 = vsel %vm456_vm4, %v454_v44, %v455_v45 }
 0x122   : > { %vm2022_vm6 = vcmp.eq.s32.totalorder %v1324_v23, %v1416_v56  ;;  %vm2023_vm7 = vcmp.eq.s32.totalorder %v1327_v26, %v1416_v56  ;;  %vm2024_vm8 = vcmp.eq.s32.totalorder %v1330_v28, %v1416_v56  ;;  %vm2025_vm9 = vcmp.eq.s32.totalorder %v1333_v29, %v1416_v56 }
 0x123   : > { %vm2026_vm10 = vcmp.eq.s32.totalorder %v1336_v30, %v1416_v56  ;;  %vm2027_vm11 = vcmp.eq.s32.totalorder %v1339_v31, %v1416_v56  ;;  %vm2028_vm12 = vcmp.eq.s32.totalorder %v1342_v32, %v1416_v56  ;;  %vm2029_vm13 = vcmp.eq.s32.totalorder %v1345_v33, %v1416_v56 }
 0x124   : > { %vm2030_vm14 = vcmp.eq.s32.totalorder %v1348_v34, %v1416_v56  ;;  %vm467_vm15 = vcmp.eq.s32.totalorder %v1353_v36, %v1416_v56  ;;  %vm2031_vm1 = vcmp.eq.s32.totalorder %v1356_v37, %v1416_v56  ;;  %vm2032_vm2 = vcmp.eq.s32.totalorder %v1359_v38, %v1416_v56 }
 0x125   : > { %vm2033_vm3 = vcmp.eq.s32.totalorder %v1362_v39, %v1416_v56  ;;  %v1448_v58 = vsel %vm2022_vm6, -inf, %v1272_v46  ;;  %v1454_v59 = vsel %vm2023_vm7, -inf, %v1276_v48  ;;  %v1460_v60 = vsel %vm2024_vm8, -inf, %v1280_v50 }
 0x126   : > { %v1466_v61 = vsel %vm2025_vm9, -inf, %v1286_v53  ;;  %v1472_v46 = vsel %vm2026_vm10, -inf, %v1294_v57  ;;  %v1478_v48 = vsel %vm2027_vm11, -inf, %v1274_v47  ;;  %v1484_v50 = vsel %vm2028_vm12, -inf, %v1278_v49 }
 0x127   : > { %v1490_v53 = vsel %vm2029_vm13, -inf, %v1284_v52  ;;  %v1496_v57 = vsel %vm2030_vm14, -inf, %v1290_v55  ;;  %v1502_v47 = vsel %vm467_vm15, -inf, %v1320_v12  ;;  %v1508_v49 = vsel %vm2031_vm1, -inf, %v1282_v51 }
 0x128   : > { %v1514_v52 = vsel %vm2032_vm2, -inf, %v1288_v54  ;;  %v1520_v55 = vsel %vm2033_vm3, -inf, %v1304_v0  ;;  %v497_v12 = vsel %vm202_vm0, %v1448_v58, -inf  ;;  %v498_v62 = vsel %vm202_vm0, %v1454_v59, -inf }
 0x129   : > { %v499_v51 = vsel %vm202_vm0, %v1460_v60, -inf  ;;  %v500_v63 = vsel %vm202_vm0, %v1466_v61, -inf  ;;  %v501_v54 = vsel %vm202_vm0, %v1472_v46, -inf  ;;  %v503_v0 = vsel %vm202_vm0, %v1478_v48, -inf }
 0x12a   : > { %v502_v1 = vmax.f32 %v497_v12, %v501_v54  ;;  %v505_v2 = vsel %vm202_vm0, %v1484_v50, -inf  ;;  %v507_v3 = vsel %vm202_vm0, %v1490_v53, -inf  ;;  %v504_v4 = vmax.f32 %v498_v62, %v503_v0 }
 0x12b   : > { %v506_v5 = vmax.f32 %v499_v51, %v505_v2  ;;  %v508_v6 = vmax.f32 %v500_v63, %v507_v3  ;;  %v509_v7 = vsel %vm202_vm0, %v1496_v57, -inf  ;;  %v513_v9 = vsel %vm202_vm0, %v1508_v49, -inf }
 0x12c   : > { %v510_v8 = vmax.f32 %v502_v1, %v509_v7  ;;  %v515_v10 = vsel %vm202_vm0, %v1514_v52, -inf  ;;  %v511_v11 = vsel %vm202_vm0, %v1502_v47, -inf  ;;  %v517_v15 = vsel %vm374_vm5, %v1520_v55, -inf }
 0x12d   : > { %v514_v13 = vmax.f32 %v506_v5, %v513_v9  ;;  %v516_v14 = vmax.f32 %v508_v6, %v515_v10  ;;  %v512_v16 = vmax.f32 %v504_v4, %v511_v11 }
 0x12e   : > { %v518_v17 = vmax.f32 %v510_v8, %v517_v15 }
 0x12f   : > { %v520_v19 = vmax.f32 %v514_v13, %v516_v14 }
 0x130   : > { %v519_v18 = vmax.f32 %v518_v17, %v512_v16 }
 0x132   : > { %v521_v20 = vmax.f32 %v519_v18, %v520_v19 }
 0x134   : > { %v522_v21 = vrot.slane %v521_v20, 4 }
 0x136   : > { %v523_v22 = vmax.f32 %v521_v20, %v522_v21 }
 0x138   : > { %v524_v24 = vrot.slane %v523_v22, 2 }
 0x13a   : > { %v525_v25 = vmax.f32 %v523_v22, %v524_v24 }
 0x13c   : > { %v526_v27 = vrot.slane %v525_v25, 1 }
 0x13e   : > { %v1548_v40 = vmax.f32 %v525_v25, %v526_v27 }
 0x140   : > { %vm528_vm4 = vcmp.eq.f32.partialorder %v1448_v58, %v1548_v40  ;;  %vm529_vm6 = vcmp.eq.f32.partialorder %v1454_v59, %v1548_v40  ;;  %vm530_vm7 = vcmp.eq.f32.partialorder %v1460_v60, %v1548_v40  ;;  %vm531_vm8 = vcmp.eq.f32.partialorder %v1466_v61, %v1548_v40 }
 0x141   : > { %vm532_vm9 = vcmp.eq.f32.partialorder %v1472_v46, %v1548_v40  ;;  %vm533_vm10 = vcmp.eq.f32.partialorder %v1478_v48, %v1548_v40  ;;  %vm534_vm11 = vcmp.eq.f32.partialorder %v1484_v50, %v1548_v40  ;;  %vm535_vm12 = vcmp.eq.f32.partialorder %v1490_v53, %v1548_v40 }
 0x142   : > { %vm536_vm13 = vcmp.eq.f32.partialorder %v1496_v57, %v1548_v40  ;;  %vm537_vm14 = vcmp.eq.f32.partialorder %v1502_v47, %v1548_v40  ;;  %vm538_vm1 = vcmp.eq.f32.partialorder %v1508_v49, %v1548_v40  ;;  %vm539_vm2 = vcmp.eq.f32.partialorder %v1514_v52, %v1548_v40 }
 0x143   : > { %vm540_vm3 = vcmp.eq.f32.partialorder %v1520_v55, %v1548_v40  ;;  %v541_v41 = vsel %vm528_vm4, %v1324_v23, 100  ;;  %v542_v42 = vsel %vm529_vm6, %v1327_v26, 100  ;;  %v543_v43 = vsel %vm530_vm7, %v1330_v28, 100 }
 0x144   : > { %v544_v44 = vsel %vm531_vm8, %v1333_v29, 100  ;;  %v545_v45 = vsel %vm532_vm9, %v1336_v30, 100  ;;  %v546_v12 = vsel %vm533_vm10, %v1339_v31, 100  ;;  %v547_v62 = vsel %vm534_vm11, %v1342_v32, 100 }
 0x145   : > { %v548_v51 = vsel %vm535_vm12, %v1345_v33, 100  ;;  %v549_v63 = vsel %vm536_vm13, %v1348_v34, 100  ;;  %v550_v54 = vsel %vm537_vm14, %v1353_v36, 100  ;;  %v551_v1 = vsel %vm538_vm1, %v1356_v37, 100 }
 0x146   : > { %v552_v0 = vsel %vm539_vm2, %v1359_v38, 100  ;;  %v553_v2 = vsel %vm540_vm3, %v1362_v39, 100  ;;  %v554_v3 = vsel %vm202_vm0, %v541_v41, 2147483647  ;;  %v555_v4 = vsel %vm202_vm0, %v542_v42, 2147483647 }
 0x147   : > { %v556_v5 = vsel %vm202_vm0, %v543_v43, 2147483647  ;;  %v557_v6 = vsel %vm202_vm0, %v544_v44, 2147483647  ;;  %v558_v7 = vsel %vm202_vm0, %v545_v45, 2147483647 }
 0x148   : > { %vm559_vm6 = vcmp.lt.s32.totalorder %v554_v3, %v558_v7  ;;  %v561_v8 = vsel %vm202_vm0, %v546_v12, 2147483647  ;;  %v564_v9 = vsel %vm202_vm0, %v547_v62, 2147483647  ;;  %v567_v10 = vsel %vm202_vm0, %v548_v51, 2147483647 }
 0x149   : > { %v560_v11 = vsel %vm559_vm6, %v554_v3, %v558_v7  ;;  %vm562_vm7 = vcmp.lt.s32.totalorder %v555_v4, %v561_v8  ;;  %vm565_vm8 = vcmp.lt.s32.totalorder %v556_v5, %v564_v9  ;;  %vm568_vm9 = vcmp.lt.s32.totalorder %v557_v6, %v567_v10 }
 0x14a   : > { %v563_v13 = vsel %vm562_vm7, %v555_v4, %v561_v8  ;;  %v566_v14 = vsel %vm565_vm8, %v556_v5, %v564_v9  ;;  %v569_v15 = vsel %vm568_vm9, %v557_v6, %v567_v10  ;;  %v570_v16 = vsel %vm202_vm0, %v549_v63, 2147483647 }
 0x14b   : > { %vm571_vm10 = vcmp.lt.s32.totalorder %v560_v11, %v570_v16  ;;  %v573_v17 = vsel %vm202_vm0, %v550_v54, 2147483647  ;;  %v576_v18 = vsel %vm202_vm0, %v551_v1, 2147483647  ;;  %v579_v19 = vsel %vm202_vm0, %v552_v0, 2147483647 }
 0x14c   : > { %v572_v20 = vsel %vm571_vm10, %v560_v11, %v570_v16  ;;  %vm574_vm11 = vcmp.lt.s32.totalorder %v563_v13, %v573_v17  ;;  %vm577_vm12 = vcmp.lt.s32.totalorder %v566_v14, %v576_v18  ;;  %vm580_vm13 = vcmp.lt.s32.totalorder %v569_v15, %v579_v19 }
 0x14d   : > { %v578_v21 = vsel %vm577_vm12, %v566_v14, %v576_v18  ;;  %v581_v22 = vsel %vm580_vm13, %v569_v15, %v579_v19  ;;  %v582_v24 = vsel %vm374_vm5, %v553_v2, 2147483647  ;;  %v575_v25 = vsel %vm574_vm11, %v563_v13, %v573_v17 }
 0x14e   : > { %vm583_vm14 = vcmp.lt.s32.totalorder %v572_v20, %v582_v24  ;;  %vm587_vm1 = vcmp.lt.s32.totalorder %v578_v21, %v581_v22  ;;  %v613_v12 = vsub.f32 %v1548_v40, %v1350_v35  ;;  %v1133_v51 = vmov 0.0  }
 0x14f   : > { %v584_v27 = vsel %vm583_vm14, %v572_v20, %v582_v24  ;;  %v588_v41 = vsel %vm587_vm1, %v578_v21, %v581_v22  ;;  %v1607_v63 = vsel %vm467_vm15, 1.0, %v1133_v51  ;;  %vm2036_vm7 = vcmp.eq.s32.totalorder %v1362_v39, %v1416_v56 }
 0x150   : > { %vm585_vm2 = vcmp.lt.s32.totalorder %v584_v27, %v575_v25  ;;  %v614_v1 = vmul.f32 1.442695, %v613_v12  ;;  %v1612_v2 = vsel %vm2036_vm7, 1.0, %v1133_v51  ;;  %vm2037_vm8 = vcmp.eq.s32.totalorder %v1359_v38, %v1416_v56 }
 0x151   : > { %v586_v42 = vsel %vm585_vm2, %v584_v27, %v575_v25  ;;  %v1617_v40 = vsel %vm2037_vm8, 1.0, %v1133_v51  ;;  %vm2038_vm9 = vcmp.eq.s32.totalorder %v1356_v37, %v1416_v56  ;;  %vm2039_vm15 = vcmp.eq.s32.totalorder %v1348_v34, %v1416_v56 }
 0x152   : > { %vm589_vm3 = vcmp.lt.s32.totalorder %v586_v42, %v588_v41  ;;  %v1622_v3 = vsel %vm2038_vm9, 1.0, %v1133_v51  ;;  %v1627_v4 = vsel %vm2039_vm15, 1.0, %v1133_v51  ;;  %vm2040_vm10 = vcmp.eq.s32.totalorder %v1345_v33, %v1416_v56 }
 0x153   : > { %v590_v43 = vsel %vm589_vm3, %v586_v42, %v588_v41  ;;  %v1632_v5 = vsel %vm2040_vm10, 1.0, %v1133_v51  ;;  %vm2041_vm11 = vcmp.eq.s32.totalorder %v1342_v32, %v1416_v56  ;;  %vm2042_vm12 = vcmp.eq.s32.totalorder %v1339_v31, %v1416_v56 }
 0x154   : > { %v591_v44 = vrot.slane %v590_v43, 4  ;;  %v1637_v6 = vsel %vm2041_vm11, 1.0, %v1133_v51  ;;  %v1642_v7 = vsel %vm2042_vm12, 1.0, %v1133_v51  ;;  %vm2043_vm14 = vcmp.eq.s32.totalorder %v1336_v30, %v1416_v56 }
 0x155   : > { %v1647_v8 = vsel %vm2043_vm14, 1.0, %v1133_v51  ;;  %vm2044_vm1 = vcmp.eq.s32.totalorder %v1333_v29, %v1416_v56  ;;  %vm2045_vm2 = vcmp.eq.s32.totalorder %v1330_v28, %v1416_v56  ;;  %1047 = vpow2.f32 %v614_v1 }
 0x156   : > { %vm592_vm4 = vcmp.lt.s32.totalorder %v590_v43, %v591_v44  ;;  %v1652_v9 = vsel %vm2044_vm1, 1.0, %v1133_v51  ;;  %v1657_v10 = vsel %vm2045_vm2, 1.0, %v1133_v51  ;;  %vm2046_vm3 = vcmp.eq.s32.totalorder %v1327_v26, %v1416_v56 }
 0x157   : > { %v593_v45 = vsel %vm592_vm4, %v590_v43, %v591_v44  ;;  %v1664_v13 = vsel %vm2046_vm3, 1.0, %v1133_v51  ;;  %vm2047_vm4 = vcmp.eq.s32.totalorder %v1324_v23, %v1416_v56 }
 0x158   : > { %v594_v62 = vrot.slane %v593_v45, 2  ;;  %v1669_v14 = vsel %vm2047_vm4, 1.0, %v1133_v51 }
 0x15a   : > { %vm595_vm6 = vcmp.lt.s32.totalorder %v593_v45, %v594_v62 }
 0x15b   : > { %v596_v54 = vsel %vm595_vm6, %v593_v45, %v594_v62 }
 0x15c   : > { %v597_v0 = vrot.slane %v596_v54, 1 }
 0x15e   : > { %vm598_vm13 = vcmp.lt.s32.totalorder %v596_v54, %v597_v0 }
 0x15f   : > { %v1659_v11 = vsel %vm598_vm13, %v596_v54, %v597_v0 }
 0x160   : > { %vm600_vm6 = vcmp.eq.s32.totalorder %v1324_v23, %v1659_v11  ;;  %vm601_vm7 = vcmp.eq.s32.totalorder %v1327_v26, %v1659_v11  ;;  %vm602_vm8 = vcmp.eq.s32.totalorder %v1330_v28, %v1659_v11  ;;  %vm603_vm9 = vcmp.eq.s32.totalorder %v1333_v29, %v1659_v11 }
 0x161   : > { %vm604_vm15 = vcmp.eq.s32.totalorder %v1336_v30, %v1659_v11  ;;  %vm605_vm10 = vcmp.eq.s32.totalorder %v1339_v31, %v1659_v11  ;;  %vm606_vm11 = vcmp.eq.s32.totalorder %v1342_v32, %v1659_v11  ;;  %vm607_vm12 = vcmp.eq.s32.totalorder %v1345_v33, %v1659_v11 }
 0x162   : > { %vm608_vm13 = vcmp.eq.s32.totalorder %v1348_v34, %v1659_v11  ;;  %vm609_vm14 = vcmp.eq.s32.totalorder %v1353_v36, %v1659_v11  ;;  %vm610_vm1 = vcmp.eq.s32.totalorder %v1356_v37, %v1659_v11  ;;  %vm611_vm2 = vcmp.eq.s32.totalorder %v1359_v38, %v1659_v11 }
 0x163   : > { %vm612_vm3 = vcmp.eq.s32.totalorder %v1362_v39, %v1659_v11  ;;  %v1701_v56 = vsel %vm600_vm6, -inf, %v1448_v58  ;;  %v1707_v15 = vsel %vm601_vm7, -inf, %v1454_v59  ;;  %v1713_v16 = vsel %vm602_vm8, -inf, %v1460_v60 }
 0x164   : > { %v1719_v17 = vsel %vm603_vm9, -inf, %v1466_v61  ;;  %v1725_v58 = vsel %vm604_vm15, -inf, %v1472_v46  ;;  %v1731_v59 = vsel %vm605_vm10, -inf, %v1478_v48  ;;  %v1737_v60 = vsel %vm606_vm11, -inf, %v1484_v50  ;;  %v1739_v61 = vpop.eup %1047 }
 0x165   : > { %v1745_v46 = vsel %vm607_vm12, -inf, %v1490_v53  ;;  %v1751_v48 = vsel %vm608_vm13, -inf, %v1496_v57  ;;  %v1757_v50 = vsel %vm609_vm14, -inf, %v1502_v47  ;;  %v1763_v18 = vsel %vm610_vm1, -inf, %v1508_v49 }
 0x166   : > { %v1769_v53 = vsel %vm611_vm2, -inf, %v1514_v52  ;;  %v1775_v57 = vsel %vm612_vm3, -inf, %v1520_v55  ;;  %v643_v47 = vsel %vm202_vm0, %v1701_v56, -inf  ;;  %v644_v19 = vsel %vm202_vm0, %v1707_v15, -inf }
 0x167   : > { %v645_v49 = vsel %vm202_vm0, %v1713_v16, -inf  ;;  %v646_v20 = vsel %vm202_vm0, %v1719_v17, -inf  ;;  %v647_v52 = vsel %vm202_vm0, %v1725_v58, -inf  ;;  %v649_v21 = vsel %vm202_vm0, %v1731_v59, -inf }
 0x168   : > { %v648_v55 = vmax.f32 %v643_v47, %v647_v52  ;;  %v650_v22 = vmax.f32 %v644_v19, %v649_v21  ;;  %v651_v24 = vsel %vm202_vm0, %v1737_v60, -inf  ;;  %v653_v25 = vsel %vm202_vm0, %v1745_v46, -inf }
 0x169   : > { %v652_v27 = vmax.f32 %v645_v49, %v651_v24  ;;  %v654_v41 = vmax.f32 %v646_v20, %v653_v25  ;;  %v655_v42 = vsel %vm202_vm0, %v1751_v48, -inf  ;;  %v657_v43 = vsel %vm202_vm0, %v1757_v50, -inf }
 0x16a   : > { %v656_v44 = vmax.f32 %v648_v55, %v655_v42  ;;  %v658_v45 = vmax.f32 %v650_v22, %v657_v43  ;;  %v659_v12 = vsel %vm202_vm0, %v1763_v18, -inf  ;;  %v661_v62 = vsel %vm202_vm0, %v1769_v53, -inf }
 0x16b   : > { %v660_v51 = vmax.f32 %v652_v27, %v659_v12  ;;  %v662_v54 = vmax.f32 %v654_v41, %v661_v62  ;;  %v663_v1 = vsel %vm374_vm5, %v1775_v57, -inf  ;;  %v1808_v0 = vsel %vm612_vm3, %v1739_v61, %v1612_v2 }
 0x16c   : > { %v664_v47 = vmax.f32 %v656_v44, %v663_v1  ;;  %v1815_v19 = vsel %vm611_vm2, %v1739_v61, %v1617_v40  ;;  %v1822_v49 = vsel %vm610_vm1, %v1739_v61, %v1622_v3  ;;  %v1829_v2 = vsel %vm609_vm14, %v1739_v61, %v1607_v63 }
 0x16d   : > { %v666_v20 = vmax.f32 %v660_v51, %v662_v54  ;;  %v1836_v40 = vsel %vm608_vm13, %v1739_v61, %v1627_v4  ;;  %v1843_v3 = vsel %vm607_vm12, %v1739_v61, %v1632_v5  ;;  %v1850_v63 = vsel %vm606_vm11, %v1739_v61, %v1637_v6 }
 0x16e   : > { %v665_v52 = vmax.f32 %v664_v47, %v658_v45  ;;  %v1857_v4 = vsel %vm605_vm10, %v1739_v61, %v1642_v7  ;;  %v1864_v5 = vsel %vm604_vm15, %v1739_v61, %v1647_v8  ;;  %v1871_v6 = vsel %vm603_vm9, %v1739_v61, %v1652_v9 }
 0x16f   : > { %v1878_v7 = vsel %vm602_vm8, %v1739_v61, %v1657_v10  ;;  %v1885_v8 = vsel %vm601_vm7, %v1739_v61, %v1664_v13  ;;  %v1892_v9 = vsel %vm600_vm6, %v1739_v61, %v1669_v14 }
 0x170   : > { %v667_v21 = vmax.f32 %v665_v52, %v666_v20 }
 0x172   : > { %v668_v55 = vrot.slane %v667_v21, 4 }
 0x174   : > { %v669_v22 = vmax.f32 %v667_v21, %v668_v55 }
 0x176   : > { %v670_v24 = vrot.slane %v669_v22, 2 }
 0x178   : > { %v671_v10 = vmax.f32 %v669_v22, %v670_v24 }
 0x17a   : > { %v672_v25 = vrot.slane %v671_v10, 1 }
 0x17c   : > { %v673_v27 = vmax.f32 %v671_v10, %v672_v25 }
 0x17e   : > { %vm674_vm4 = vcmp.eq.f32.partialorder %v1701_v56, %v673_v27  ;;  %vm675_vm8 = vcmp.eq.f32.partialorder %v1707_v15, %v673_v27  ;;  %vm676_vm7 = vcmp.eq.f32.partialorder %v1713_v16, %v673_v27  ;;  %vm677_vm9 = vcmp.eq.f32.partialorder %v1719_v17, %v673_v27 }
 0x17f   : > { %vm678_vm15 = vcmp.eq.f32.partialorder %v1725_v58, %v673_v27  ;;  %vm679_vm6 = vcmp.eq.f32.partialorder %v1731_v59, %v673_v27  ;;  %vm680_vm10 = vcmp.eq.f32.partialorder %v1737_v60, %v673_v27  ;;  %vm681_vm11 = vcmp.eq.f32.partialorder %v1745_v46, %v673_v27 }
 0x180   : > { %vm682_vm12 = vcmp.eq.f32.partialorder %v1751_v48, %v673_v27  ;;  %vm683_vm13 = vcmp.eq.f32.partialorder %v1757_v50, %v673_v27  ;;  %vm684_vm14 = vcmp.eq.f32.partialorder %v1763_v18, %v673_v27  ;;  %vm685_vm1 = vcmp.eq.f32.partialorder %v1769_v53, %v673_v27 }
 0x181   : > { %vm686_vm2 = vcmp.eq.f32.partialorder %v1775_v57, %v673_v27  ;;  %v687_v11 = vsel %vm674_vm4, %v1324_v23, 100  ;;  %v688_v13 = vsel %vm675_vm8, %v1327_v26, 100  ;;  %v689_v14 = vsel %vm676_vm7, %v1330_v28, 100 }
 0x182   : > { %v690_v56 = vsel %vm677_vm9, %v1333_v29, 100  ;;  %v691_v15 = vsel %vm678_vm15, %v1336_v30, 100  ;;  %v692_v16 = vsel %vm679_vm6, %v1339_v31, 100  ;;  %v693_v17 = vsel %vm680_vm10, %v1342_v32, 100 }
 0x183   : > { %v694_v58 = vsel %vm681_vm11, %v1345_v33, 100  ;;  %v695_v59 = vsel %vm682_vm12, %v1348_v34, 100  ;;  %v696_v60 = vsel %vm683_vm13, %v1353_v36, 100  ;;  %v697_v46 = vsel %vm684_vm14, %v1356_v37, 100 }
 0x184   : > { %v698_v48 = vsel %vm685_vm1, %v1359_v38, 100  ;;  %v699_v50 = vsel %vm686_vm2, %v1362_v39, 100  ;;  %v700_v18 = vsel %vm202_vm0, %v687_v11, 2147483647  ;;  %v701_v53 = vsel %vm202_vm0, %v688_v13, 2147483647 }
 0x185   : > { %v702_v57 = vsel %vm202_vm0, %v689_v14, 2147483647  ;;  %v703_v41 = vsel %vm202_vm0, %v690_v56, 2147483647  ;;  %v704_v42 = vsel %vm202_vm0, %v691_v15, 2147483647  ;;  %v759_v43 = vsub.f32 %v673_v27, %v1350_v35 }
 0x186   : > { %vm705_vm3 = vcmp.lt.s32.totalorder %v700_v18, %v704_v42  ;;  %v707_v44 = vsel %vm202_vm0, %v692_v16, 2147483647  ;;  %v710_v45 = vsel %vm202_vm0, %v693_v17, 2147483647  ;;  %v713_v12 = vsel %vm202_vm0, %v694_v58, 2147483647 }
 0x187   : > { %v706_v62 = vsel %vm705_vm3, %v700_v18, %v704_v42  ;;  %vm708_vm4 = vcmp.lt.s32.totalorder %v701_v53, %v707_v44  ;;  %vm711_vm8 = vcmp.lt.s32.totalorder %v702_v57, %v710_v45  ;;  %vm714_vm7 = vcmp.lt.s32.totalorder %v703_v41, %v713_v12 }
 0x188   : > { %v709_v51 = vsel %vm708_vm4, %v701_v53, %v707_v44  ;;  %v712_v54 = vsel %vm711_vm8, %v702_v57, %v710_v45  ;;  %v715_v1 = vsel %vm714_vm7, %v703_v41, %v713_v12  ;;  %v716_v47 = vsel %vm202_vm0, %v695_v59, 2147483647 }
 0x189   : > { %vm717_vm9 = vcmp.lt.s32.totalorder %v706_v62, %v716_v47  ;;  %v719_v20 = vsel %vm202_vm0, %v696_v60, 2147483647  ;;  %v722_v35 = vsel %vm202_vm0, %v697_v46, 2147483647  ;;  %v725_v52 = vsel %vm202_vm0, %v698_v48, 2147483647 }
 0x18a   : > { %v718_v21 = vsel %vm717_vm9, %v706_v62, %v716_v47  ;;  %vm720_vm15 = vcmp.lt.s32.totalorder %v709_v51, %v719_v20  ;;  %vm723_vm6 = vcmp.lt.s32.totalorder %v712_v54, %v722_v35  ;;  %vm726_vm10 = vcmp.lt.s32.totalorder %v715_v1, %v725_v52 }
 0x18b   : > { %v721_v55 = vsel %vm720_vm15, %v709_v51, %v719_v20  ;;  %v724_v22 = vsel %vm723_vm6, %v712_v54, %v722_v35  ;;  %v727_v24 = vsel %vm726_vm10, %v715_v1, %v725_v52  ;;  %v728_v10 = vsel %vm374_vm5, %v699_v50, 2147483647 }
 0x18c   : > { %vm729_vm11 = vcmp.lt.s32.totalorder %v718_v21, %v728_v10  ;;  %vm733_vm12 = vcmp.lt.s32.totalorder %v724_v22, %v727_v24  ;;  %v760_v25 = vmul.f32 1.442695, %v759_v43  ;;  %v616_v15 = vadd.f32 1.0, %v1739_v61 }
 0x18d   : > { %v730_v27 = vsel %vm729_vm11, %v718_v21, %v728_v10  ;;  %v734_v11 = vsel %vm733_vm12, %v724_v22, %v727_v24  ;;  %vm793_vm3 = vcmask 1043456  }
 0x18e   : > { %vm731_vm13 = vcmp.lt.s32.totalorder %v730_v27, %v721_v55  ;;  %1049 = vpow2.f32 %v760_v25 }
 0x18f   : > { %v732_v13 = vsel %vm731_vm13, %v730_v27, %v721_v55 }
 0x190   : > { %vm735_vm14 = vcmp.lt.s32.totalorder %v732_v13, %v734_v11 }
 0x191   : > { %v736_v14 = vsel %vm735_vm14, %v732_v13, %v734_v11 }
 0x192   : > { %v737_v56 = vrot.slane %v736_v14, 4 }
 0x194   : > { %v1050_v16 = vpop.eup %1049  ;;  %vm738_vm1 = vcmp.lt.s32.totalorder %v736_v14, %v737_v56 }
 0x195   : > { %v739_v17 = vsel %vm738_vm1, %v736_v14, %v737_v56  ;;  %v1935_v58 = vadd.f32 %v1050_v16, %v616_v15 }
 0x196   : > { %v740_v59 = vrot.slane %v739_v17, 2 }
 0x197   : > { %1051 = vrcp.f32 %v1935_v58 }
 0x198   : > { %vm741_vm5 = vcmp.lt.s32.totalorder %v739_v17, %v740_v59 }
 0x199   : > { %v742_v60 = vsel %vm741_vm5, %v739_v17, %v740_v59 }
 0x19a   : > { %v743_v46 = vrot.slane %v742_v60, 1 }
 0x19c   : > { %vm744_vm2 = vcmp.lt.s32.totalorder %v742_v60, %v743_v46 }
 0x19d   : > { %v745_v48 = vsel %vm744_vm2, %v742_v60, %v743_v46  ;;  %vm780_vm2 = vcmask 818176  }
 0x19e   : > { %vm758_vm4 = vcmp.eq.s32.totalorder %v1362_v39, %v745_v48  ;;  %vm757_vm8 = vcmp.eq.s32.totalorder %v1359_v38, %v745_v48  ;;  %vm756_vm7 = vcmp.eq.s32.totalorder %v1356_v37, %v745_v48  ;;  %vm755_vm9 = vcmp.eq.s32.totalorder %v1353_v36, %v745_v48 }
 0x19f   : > { %v775_v61 = vsel %vm758_vm4, %v1050_v16, %v1808_v0  ;;  %v774_v50 = vsel %vm757_vm8, %v1050_v16, %v1815_v19  ;;  %v773_v18 = vsel %vm756_vm7, %v1050_v16, %v1822_v49  ;;  %v772_v53 = vsel %vm755_vm9, %v1050_v16, %v1829_v2  ;;  %v1052_v0 = vpop.eup %1051 }
 0x1a0   : > { %954 = vmatpush.msk.msra.mxu1 %vm793_vm3, %v775_v61  ;;  %974 = vmatpush.msk.msrb.mxu3 %vm793_vm3, %v775_v61  ;;  %vm754_vm15 = vcmp.eq.s32.totalorder %v1348_v34, %v745_v48  ;;  %vm753_vm6 = vcmp.eq.s32.totalorder %v1345_v33, %v745_v48  ;;  %vm752_vm10 = vcmp.eq.s32.totalorder %v1342_v32, %v745_v48 }
 0x1a1   : > { %v771_v37 = vsel %vm754_vm15, %v1050_v16, %v1836_v40  ;;  %v770_v36 = vsel %vm753_vm6, %v1050_v16, %v1843_v3  ;;  %v769_v38 = vsel %vm752_vm10, %v1050_v16, %v1850_v63  ;;  %vm751_vm11 = vcmp.eq.s32.totalorder %v1339_v31, %v745_v48 }
 0x1a2   : > { %801 = vmatpush.msra.mxu1 %v774_v50  ;;  %975 = vmatpush.msrb.mxu3 %v774_v50  ;;  %v768_v39 = vsel %vm751_vm11, %v1050_v16, %v1857_v4  ;;  %vm750_vm12 = vcmp.eq.s32.totalorder %v1336_v30, %v745_v48  ;;  %vm749_vm13 = vcmp.eq.s32.totalorder %v1333_v29, %v745_v48  ;;  %v778_v29 = vld [vmem:[%s2020_s2 + $0x10] sm:$0xff] }
 0x1a3   : > { %v767_v33 = vsel %vm750_vm12, %v1050_v16, %v1864_v5  ;;  %v766_v32 = vsel %vm749_vm13, %v1050_v16, %v1871_v6  ;;  %vm748_vm14 = vcmp.eq.s32.totalorder %v1330_v28, %v745_v48  ;;  %vm747_vm1 = vcmp.eq.s32.totalorder %v1327_v26, %v745_v48  ;;  %v779_v26 = vld [vmem:[%s2020_s2 + $0x18] sm:$0xff]  ;;  %v777_v28 = vld [vmem:[%s2020_s2 + $0x8] sm:$0xff] }
 0x1a4   : > { %802 = vmatpush.msra.mxu1 %v773_v18  ;;  %976 = vmatpush.msrb.mxu3 %v773_v18  ;;  %v765_v31 = vsel %vm748_vm14, %v1050_v16, %v1878_v7  ;;  %v764_v34 = vsel %vm747_vm1, %v1050_v16, %v1885_v8  ;;  %vm746_vm5 = vcmp.eq.s32.totalorder %v1324_v23, %v745_v48  ;;  %v776_v23 = vld [vmem:[%s2020_s2] sm:$0xff] }
 0x1a5   : > { %v763_v30 = vsel %vm746_vm5, %v1050_v16, %v1892_v9  ;;  %v827_v19 = vmul.f32 %v1052_v0, %v1935_v58 }
 0x1a6   : > { %803 = vmatpush.msra.mxu1 %v772_v53  ;;  %977 = vmatpush.msrb.mxu3 %v772_v53 }
 0x1a7   : > { %v828_v49 = vsub.f32 2.0, %v827_v19 }
 0x1a8   : > { %804 = vmatpush.msra.mxu1 %v771_v37  ;;  %978 = vmatpush.msrb.mxu3 %v771_v37 }
 0x1a9   : > { %v829_v2 = vmul.f32 %v1052_v0, %v828_v49 }
 0x1aa   : > { %805 = vmatpush.msra.mxu1 %v770_v36  ;;  %979 = vmatpush.msrb.mxu3 %v770_v36 }
 0x1ac   : > { %806 = vmatpush.msra.mxu1 %v769_v38  ;;  %980 = vmatpush.msrb.mxu3 %v769_v38 }
 0x1ae   : > { %807 = vmatpush.msra.mxu1 %v768_v39  ;;  %981 = vmatpush.msrb.mxu3 %v768_v39 }
 0x1b0   : > { %808 = vmatpush.msra.mxu1 %v767_v33  ;;  %982 = vmatpush.msrb.mxu3 %v767_v33 }
 0x1b2   : > { %809 = vmatpush.msra.mxu1 %v766_v32  ;;  %983 = vmatpush.msrb.mxu3 %v766_v32 }
 0x1b4   : > { %810 = vmatpush.msra.mxu1 %v765_v31  ;;  %984 = vmatpush.msrb.mxu3 %v765_v31 }
 0x1b6   : > { %811 = vmatpush.msra.mxu1 %v764_v34  ;;  %985 = vmatpush.msrb.mxu3 %v764_v34 }
 0x1b8   : > { %812 = vmatpush.msra.mxu1 %v763_v30  ;;  %986 = vmatpush.msrb.mxu3 %v763_v30 }
 0x1b9   : > { %955 = vmatmul.msk.f32.vlgmr.msra.gmra.mxu1 %vm780_vm2, %v776_v23  ;;  %958 = vmatmul.msk.f32.vlgmr.msrb.gmra.mxu3 %vm780_vm2, %v779_v26 }
 0x1c1   : > { %956 = vmatmul.msk.f32.gmra.mxu1 %vm780_vm2, %v777_v28 }
 0x1c9   : > { %957 = vmatmul.msk.f32.gmra.mxu1 %vm780_vm2, %v778_v29 }
 0x236   : > { %v814_v40 = vpop.f32.mrf.mxu1 }
 0x237   : > { %v830_v3 = vmul.f32 %v829_v2, %v814_v40 }
 0x239   : > { %834 = vst.msk [vmem:[%s185_s6] sm:$0xff] %vm202_vm0, %v830_v3 }
 0x23c   : > { %v823_v63 = vpop.f32.mrf.mxu3 }
 0x23d   : > { %v833_v4 = vmul.f32 %v829_v2, %v823_v63 }
 0x23e   : > { %v817_v5 = vpop.f32.mrf.mxu1 }
 0x23f   : > { %837 = vst.msk [vmem:[%s185_s6 + $0x18] sm:$0xff] %vm202_vm0, %v833_v4  ;;  %v831_v6 = vmul.f32 %v829_v2, %v817_v5 }
 0x241   : > { %835 = vst.msk [vmem:[%s185_s6 + $0x8] sm:$0xff] %vm202_vm0, %v831_v6 }
 0x246   : > { %v820_v7 = vpop.f32.mrf.mxu1 }
 0x247   : > { %v832_v8 = vmul.f32 %v829_v2, %v820_v7 }
 0x249   : > { %836 = vst.msk [vmem:[%s185_s6 + $0x10] sm:$0xff] %vm202_vm0, %v832_v8 }
 0x24a   : > { %1080 = shalt.err (!%p1077_p5)
}
 0x24b   : > { %s1134_s30 = smov 128   ;;  %s1135_s4 = smov 8  }
 0x24c   : > { %987 = dma.vmem_to_hbm [thread:$0]  (%p1196_p4), %s853_s11, 512, %s855_s18, %s839_s19, %s1134_s30, %s1134_s30, %s1135_s4  }
 0x24d PF: > { %p993_p6 = scmp.ge.s32.totalorder %s1131_s17, 2  ;;  %s869_s5 = sand.u32 1, %s1111_s12  }
 0x24e   : > { %s870_s6 = scalar_lea.sflag [#allocation3], %s869_s5 }
 0x24f   : > { %p990_p7 = pnand %p993_p6, %p1203_p8 }
 0x251   : > { %p991_p9 = pneg %p990_p7 }
 0x253   : > { %1106 = dma.done.wait (%p991_p9), %s870_s6, 512  }
 0x254   : > { %1108 = vsyncadd (%p991_p9), %s870_s6, 4294966784  ;;  %s16_s17 = sadd.s32 1, %s1131_s17   ;;  %s2048_s12 = smov %s1115_s13 }
 0x255   : > { %p13_p10 = scmp.ge.s32.totalorder %s16_s17, 4   ;;  %s2049_s13 = smov %s1119_s14 }
 0x256   : > { %s2050_s14 = smov %s1209_s25  ;;  %s2051_s15 = smov %s1127_s16 }
 0x257   : > { %s2052_s16 = smov %s2054_s20  ;;  %15 = sbr.rel (!%p13_p10) target bundleno = 4 (0x4), region = 67 }
 0x25c   :  { %876 = vsyncpa [#allocation3], 1 }
 0x25d   :  { %878 = vsyncpa [#allocation3 + $0x1], 1 }

</bundles_post_ra>
